<compile_context>
chip_gen: v5e
topology: v5e:2x2
jax: 0.10.0
libtpu: 0.0.40
codegen_flags: <defaults>
</compile_context>

<pallas_src>
import jax
import jax.numpy as jnp
from jax.experimental import pallas as pl
from jax.experimental.pallas import tpu as pltpu


# Size thresholds (overridable per-call, mainly so tests can exercise every
# path with small deterministic inputs).
_SMALL_BYPASS_BYTES = 256 * 1024        # below: skip pallas, use jnp.copy
_MULTI_DMA_BYTES = 8 * 1024 * 1024      # above: split into multiple DMAs
_MAX_DMA_SLICES = 4


# --------------------------------------------------------------------------
# Primary path: NullConnection is a pure identity. Do not launch a kernel.
# --------------------------------------------------------------------------
def null_connection(x, res=None, layer_idx=None):
    """Faithful NullConnection.forward(x, _, __) -> x.

    `res` and `layer_idx` are accepted for API parity and ignored, exactly
    like the PyTorch module. Returns the *aliased* input (as PyTorch does);
    if the caller donates/overwrites x afterwards, use null_connection_copy.
    """
    del res, layer_idx
    return x


# --------------------------------------------------------------------------
# Fallback path: identity that materializes a fresh output buffer.
# --------------------------------------------------------------------------
def _make_hbm_copy_kernel(slices):
    """Builds a kernel issuing one HBM->HBM DMA per (start, size) slice.

    `slices` is a static Python list of (start, size) along the leading dim,
    or None for a single whole-ref copy (also covers 0-d inputs).
    All copies are started before any wait, so multiple DMA descriptors are
    in flight simultaneously.
    """

    def kernel(x_hbm_ref, o_hbm_ref, copy_sems):
        copies = []
        if slices is None:
            copies.append(
                pltpu.make_async_copy(x_hbm_ref, o_hbm_ref, copy_sems.at[0])
            )
        else:
            for i, (start, size) in enumerate(slices):
                copies.append(
                    pltpu.make_async_copy(
                        x_hbm_ref.at[pl.ds(start, size)],
                        o_hbm_ref.at[pl.ds(start, size)],
                        copy_sems.at[i],
                    )
                )
        for cp in copies:
            cp.start()
        for cp in copies:
            cp.wait()

    return kernel


def null_connection_copy(
    x,
    res=None,
    layer_idx=None,
    *,
    small_bypass_bytes=_SMALL_BYPASS_BYTES,
    multi_dma_bytes=_MULTI_DMA_BYTES,
):
    """Identity that materializes a fresh output buffer.

    Small tensors: jnp.copy (no pallas launch overhead, fusable by XLA).
    Otherwise: direct HBM->HBM DMA(s) under memory_space=pl.ANY — no VMEM
    staging, no grid, no vector stores.
    """
    del res, layer_idx
    nbytes = x.size * x.dtype.itemsize

    # Tiny-tensor bypass: pallas custom-call launch (~µs) would be 100–1000x
    # the copy cost; let XLA handle it natively (and fuse/overlap it).
    if nbytes < small_bypass_bytes:
        return jnp.copy(x)

    # Decide how many DMA descriptors to issue.
    if nbytes >= multi_dma_bytes and x.ndim >= 1 and x.shape[0] >= 2:
        n_slices = min(_MAX_DMA_SLICES, x.shape[0])
    else:
        n_slices = 1

    if n_slices == 1:
        slices = None
    else:
        dim0 = x.shape[0]
        base, rem = divmod(dim0, n_slices)
        slices = []
        start = 0
        for i in range(n_slices):
            size = base + (1 if i < rem else 0)
            slices.append((start, size))
            start += size

    kernel = _make_hbm_copy_kernel(slices)

    return pl.pallas_call(
        kernel,
        out_shape=jax.ShapeDtypeStruct(x.shape, x.dtype),
        in_specs=[pl.BlockSpec(memory_space=pl.ANY)],
        out_specs=pl.BlockSpec(memory_space=pl.ANY),
        scratch_shapes=[pltpu.SemaphoreType.DMA((n_slices,))],
        # Let XLA's scheduler overlap neighboring compute with this copy:
        # it reads nbytes and writes nbytes of HBM, zero flops.
        cost_estimate=pl.CostEstimate(
            flops=0, transcendentals=0, bytes_accessed=2 * nbytes
        ),
    )(x)


if __name__ == "__main__":
    key = jax.random.PRNGKey(0)
    k_x, k_res = jax.random.split(key)

    batch, seq, hidden = 2, 8, 32
    x = jax.random.normal(k_x, (batch, seq, hidden), dtype=jnp.float32)
    # The two ignored arguments of forward(x, _, __):
    res = jax.random.normal(k_res, (batch, seq, hidden), dtype=jnp.float32)
    layer_idx = 0

    # 1) Primary (zero-cost) path — matches PyTorch exactly (aliased return).
    out = jax.block_until_ready(null_connection(x, res, layer_idx))
    assert out.shape == x.shape and out.dtype == x.dtype
    assert bool(jnp.array_equal(out, x))

    # 2) Copy path, tiny-tensor bypass (no pallas launch) — bit-exact copy.
    out_bypass = jax.block_until_ready(null_connection_copy(x, res, layer_idx))
    assert out_bypass.shape == x.shape and out_bypass.dtype == x.dtype
    assert bool(jnp.array_equal(out_bypass, x))

    # 3) Force the single-descriptor HBM->HBM DMA Pallas kernel.
    out_dma = jax.block_until_ready(
        null_connection_copy(x, res, layer_idx, small_bypass_bytes=0)
    )
    assert out_dma.shape == x.shape and out_dma.dtype == x.dtype
    assert bool(jnp.array_equal(out_dma, x))

    # 4) Force the multi-descriptor (split along leading dim) DMA kernel.
    out_multi = jax.block_until_ready(
        null_connection_copy(
            x, res, layer_idx, small_bypass_bytes=0, multi_dma_bytes=0
        )
    )
    assert out_multi.shape == x.shape and out_multi.dtype == x.dtype
    assert bool(jnp.array_equal(out_multi, x))

    print("KERNEL_OK")
</pallas_src>

<mosaic_0001>
module attributes {stable_mosaic.version = 11 : i64} {
  func.func @kernel(%arg0: memref<2x8x32xf32, #tpu.memory_space<any>>, %arg1: memref<2x8x32xf32, #tpu.memory_space<any>>, %arg2: memref<1x!tpu.dma_semaphore, #tpu.memory_space<semaphore_mem>>) attributes {dimension_semantics = [], scalar_prefetch = 0 : i64, scratch_operands = 1 : i64, tpu.core_type = #tpu.core_type<tc>} {
    %c0_i32 = arith.constant 0 : i32
    %0 = tpu.memref_slice %arg2[%c0_i32] : memref<1x!tpu.dma_semaphore, #tpu.memory_space<semaphore_mem>> -> memref<1x!tpu.dma_semaphore, #tpu.memory_space<semaphore_mem>>
    %1 = tpu.memref_squeeze %0 : memref<1x!tpu.dma_semaphore, #tpu.memory_space<semaphore_mem>> -> memref<!tpu.dma_semaphore, #tpu.memory_space<semaphore_mem>>
    tpu.enqueue_dma source(%arg0 : memref<2x8x32xf32, #tpu.memory_space<any>>) target(%arg1 : memref<2x8x32xf32, #tpu.memory_space<any>>) target_semaphore(%1 : memref<!tpu.dma_semaphore, #tpu.memory_space<semaphore_mem>>)
    %c0_i32_0 = arith.constant 0 : i32
    %2 = tpu.memref_slice %arg2[%c0_i32_0] : memref<1x!tpu.dma_semaphore, #tpu.memory_space<semaphore_mem>> -> memref<1x!tpu.dma_semaphore, #tpu.memory_space<semaphore_mem>>
    %3 = tpu.memref_squeeze %2 : memref<1x!tpu.dma_semaphore, #tpu.memory_space<semaphore_mem>> -> memref<!tpu.dma_semaphore, #tpu.memory_space<semaphore_mem>>
    tpu.wait_dma2 semaphore(%3 : memref<!tpu.dma_semaphore, #tpu.memory_space<semaphore_mem>>) src(%arg0 : memref<2x8x32xf32, #tpu.memory_space<any>>) dst(%arg1 : memref<2x8x32xf32, #tpu.memory_space<any>>)
    return
  }
}

</mosaic_0001>

<bundles_post_ra>
// kernel: tpu_custom_call.1
= control target key start
LH: loop header
LB: loop body
LE: loop exit
PB: predicated region body
PF: predicated region fallthrough
CT: control target
= control target key end

     0   :  { %s33_s12 = smov [#allocation2]   ;;  %s34_s13 = smov [#allocation3]   ;;  %s52_s0 = inlined_call_operand.hbm [shape: f32[2,8,32], index: 0, kind: input, shape index: {}]   ;;  %s53_s1 = inlined_call_operand.hbm [shape: f32[2,8,32], index: 1, kind: output, shape index: {}]  }
   0x1   :  { %s10_s8 = sshll.u32 %s52_s0, 4  ;;  %s12_s11 = sshll.u32 %s53_s1, 4  ;;  %s11_s8 = int_to_ptr.hbm [resolvable:$true] %s10_s8  ;;  %s13_s11 = int_to_ptr.hbm [resolvable:$true] %s12_s11 }
   0x2   :  { %s35_s14 = smov 0  }
   0x3   :  { %16 = dma.general %s11_s8, 256, %s13_s11, %s33_s12, %s34_s13, [#allocation4], %s35_s14, 0  }
   0x4   :  { %31 = dma.done.wait [#allocation2], 256 }
   0x5   :  { %32 = vsyncadd [#allocation2], 4294967040 }
   0x6   :  { %21 = vsyncmov [#allocation2] }
   0x9   :  { %s22_s15 = vpop.sfrf %21 }
   0xa   :  { %p27_p0 = scmp.ne.s32.totalorder %s22_s15, 0 }
   0xc   :  { %26 = shalt.err (%p27_p0)  }

</bundles_post_ra>
